<compile_context>
chip_gen: v7x
topology: tpu7x:2x2x1
jax: 0.10.0
libtpu: 0.0.40
codegen_flags: <defaults>
</compile_context>

<pallas_src>
import functools

import jax
import jax.numpy as jnp
from jax import lax
from jax.experimental import pallas as pl
from jax.experimental.pallas import tpu as pltpu


def _self_attention_kernel(x_ref, wqkv_ref, bqkv_ref, o_ref, *, e, ep, tq, tkv):
    """One grid step handles a tile of Bt batch elements.

    x_ref    : (Bt, S, E)     f32 input tile (unpadded; cast to bf16 in-kernel)
    wqkv_ref : (E, 3*Ep)      bf16 fused, pre-transposed [scale*Wq^T | Wk^T | Wv^T]
    bqkv_ref : (1, 3*Ep)      f32 fused bias [scale*bq | bk | bv]
    o_ref    : (Bt, S, E)     f32 output tile
    """
    seq = x_ref.shape[1]

    x = x_ref[...].astype(jnp.bfloat16)          # in-kernel cast (VPU filler under MXU)
    w = wqkv_ref[...]                            # bf16

    # Fused QKV projection; f32 accumulation on the MXU.
    qkv = lax.dot_general(
        x, w,
        dimension_numbers=(((2,), (0,)), ((), ())),
        preferred_element_type=jnp.float32,
    )                                            # (Bt, S, 3*Ep) f32
    qkv = qkv + bqkv_ref[...]                    # bias broadcast, f32
    qkv = qkv.astype(jnp.bfloat16)               # single cast; f32 copy dies here

    q = qkv[..., :ep]                            # (Bt, S, Ep) bf16 (already pre-scaled)
    k = qkv[..., ep:2 * ep]
    v = qkv[..., 2 * ep:]

    # KV-tiled online-softmax (flash).  All statistics in f32.  Padded columns of
    # q/k/v are exactly zero, so padding is mathematically inert.
    for qs in range(0, seq, tq):
        nq = min(tq, seq - qs)
        qt = q[:, qs:qs + nq, :]                 # (Bt, nq, Ep) bf16

        m = None
        l = None
        acc = None
        for ks in range(0, seq, tkv):
            nk = min(tkv, seq - ks)
            kt = k[:, ks:ks + nk, :]             # (Bt, nk, Ep) bf16
            vt = v[:, ks:ks + nk, :]             # (Bt, nk, Ep) bf16

            # TODO(synk): if bundle dumps show XLU vxpose from this NT contraction
            # binding at large S*Ep, emit K tiles pre-transposed as (Ep, nk) instead.
            s = lax.dot_general(
                qt, kt,
                dimension_numbers=(((2,), (2,)), ((0,), (0,))),
                preferred_element_type=jnp.float32,
            )                                    # (Bt, nq, nk) f32, scale already folded in

            if m is None:
                m = jnp.max(s, axis=-1, keepdims=True)
                p = jnp.exp(s - m)
                l = jnp.sum(p, axis=-1, keepdims=True)
                acc = lax.dot_general(
                    p.astype(jnp.bfloat16), vt,
                    dimension_numbers=(((2,), (1,)), ((0,), (0,))),
                    preferred_element_type=jnp.float32,
                )                                # (Bt, nq, Ep) f32
            else:
                m_new = jnp.maximum(m, jnp.max(s, axis=-1, keepdims=True))
                alpha = jnp.exp(m - m_new)
                p = jnp.exp(s - m_new)
                l = alpha * l + jnp.sum(p, axis=-1, keepdims=True)
                acc = alpha * acc + lax.dot_general(
                    p.astype(jnp.bfloat16), vt,
                    dimension_numbers=(((2,), (1,)), ((0,), (0,))),
                    preferred_element_type=jnp.float32,
                )
                m = m_new

        out_t = acc * pl.reciprocal(l, approx=True)          # (Bt, nq, Ep) f32
        o_ref[:, qs:qs + nq, :] = out_t[..., :e].astype(o_ref.dtype)


def _vmem_capacity_bytes():
    """Generation-aware VMEM capacity; falls back to the smallest (v7x, 64 MiB)."""
    try:
        return int(pltpu.get_tpu_info().vmem_capacity_bytes)
    except Exception:
        return 64 << 20


def _choose_batch_tile(batch, seq, e, ep, tq, tkv, capacity):
    """Pick Bt: several grid steps per core (hide DMA), under an honest VMEM budget."""
    per_batch = (
        2 * seq * e * 4          # x tile f32, double-buffered
        + 2 * seq * e * 4        # output tile f32, double-buffered
        + seq * 3 * ep * 4       # fused qkv (f32)
        + seq * 3 * ep * 2       # fused qkv (bf16)
        + 2 * tq * tkv * 4       # scores + p (f32)
        + tq * ep * 4            # flash accumulator (f32)
        + 2 * tq * 4             # m / l statistics (f32)
    )
    fixed = e * 3 * ep * 2 + 3 * ep * 4   # single-buffered fused weight (bf16) + bias (f32)
    budget = int(capacity * 0.6)          # headroom for compiler scratch / spills
    vmem_bt = max(1, (budget - fixed) // max(per_batch, 1))

    # Target at least min(B, 8) grid steps so each TensorCore gets multiple steps
    # and BlockSpec double-buffering actually overlaps DMA with compute.
    desired_steps = min(batch, 8)
    bt = (batch + desired_steps - 1) // desired_steps
    return max(1, min(bt, vmem_bt, batch))


def self_attention(x, wq, bq, wk, bk, wv, bv):
    """x: (B, S, E) float32; W*: (E, E) PyTorch (out, in); b*: (E,). Returns (B, S, E)."""
    B, S, E = x.shape
    Ep = ((E + 127) // 128) * 128                 # lane-dense padded projection output dim

    # Fold the 1/sqrt(E) score scale into the query projection (exact, one-time prep).
    scale = jnp.float32(1.0) / jnp.sqrt(jnp.float32(E))

    def prep_w(w, s=None):                        # (out,in) -> transposed, output-dim padded
        wt = w.T                                  # (E_in, E_out)
        if s is not None:
            wt = wt * s
        return jnp.pad(wt, ((0, 0), (0, Ep - E)))

    def prep_b(b, s=None):
        if s is not None:
            b = b * s
        return jnp.pad(b, (0, Ep - E))

    w_qkv = jnp.concatenate(
        [prep_w(wq, scale), prep_w(wk), prep_w(wv)], axis=1
    ).astype(jnp.bfloat16)                        # (E, 3*Ep) bf16
    b_qkv = jnp.concatenate(
        [prep_b(bq, scale), prep_b(bk), prep_b(bv)]
    ).reshape(1, 3 * Ep).astype(jnp.float32)      # (1, 3*Ep) f32

    capacity = _vmem_capacity_bytes()
    tq = min(256, S)                              # flash q-tile rows
    tkv = min(512, S)                             # flash kv-tile rows
    Bt = _choose_batch_tile(B, S, E, Ep, tq, tkv, capacity)
    grid = ((B + Bt - 1) // Bt,)

    kernel = functools.partial(_self_attention_kernel, e=E, ep=Ep, tq=tq, tkv=tkv)

    def build(single_buffer_weights):
        extra = {"pipeline_mode": pl.Buffered(1)} if single_buffer_weights else {}
        return pl.pallas_call(
            kernel,
            out_shape=jax.ShapeDtypeStruct((B, S, E), x.dtype),
            grid_spec=pltpu.PrefetchScalarGridSpec(
                num_scalar_prefetch=0,
                grid=grid,
                in_specs=[
                    pl.BlockSpec((Bt, S, E), lambda b: (b, 0, 0)),           # x tile
                    pl.BlockSpec((E, 3 * Ep), lambda b: (0, 0), **extra),    # fused Wqkv
                    pl.BlockSpec((1, 3 * Ep), lambda b: (0, 0), **extra),    # fused bias
                ],
                out_specs=pl.BlockSpec((Bt, S, E), lambda b: (b, 0, 0)),
            ),
            compiler_params=pltpu.CompilerParams(
                dimension_semantics=("parallel",),
                vmem_limit_bytes=int(capacity * 0.75),
            ),
        )

    try:
        return build(True)(x, w_qkv, b_qkv)
    except Exception:
        # Fallback: some jax versions may reject single-buffered (Buffered(1)) inputs.
        return build(False)(x, w_qkv, b_qkv)


def _reference(x, wq, bq, wk, bk, wv, bv):
    q = jnp.einsum("bse,oe->bso", x, wq) + bq
    k = jnp.einsum("bse,oe->bso", x, wk) + bk
    v = jnp.einsum("bse,oe->bso", x, wv) + bv
    scores = jnp.einsum("bqe,bke->bqk", q, k) / jnp.sqrt(jnp.float32(x.shape[-1]))
    attn = jax.nn.softmax(scores, axis=-1)
    return jnp.einsum("bqk,bke->bqe", attn, v)


if __name__ == "__main__":
    B, S, E = 2, 8, 32

    key = jax.random.PRNGKey(0)
    kx, kwq, kbq, kwk, kbk, kwv, kbv = jax.random.split(key, 7)

    x = jax.random.normal(kx, (B, S, E), dtype=jnp.float32)

    # Deterministic parameter init (mimicking nn.Linear uniform(-1/sqrt(E), 1/sqrt(E))).
    bound = 1.0 / jnp.sqrt(jnp.float32(E))
    wq = jax.random.uniform(kwq, (E, E), jnp.float32, -bound, bound)
    bq = jax.random.uniform(kbq, (E,),   jnp.float32, -bound, bound)
    wk = jax.random.uniform(kwk, (E, E), jnp.float32, -bound, bound)
    bk = jax.random.uniform(kbk, (E,),   jnp.float32, -bound, bound)
    wv = jax.random.uniform(kwv, (E, E), jnp.float32, -bound, bound)
    bv = jax.random.uniform(kbv, (E,),   jnp.float32, -bound, bound)

    out = self_attention(x, wq, bq, wk, bk, wv, bv)
    out = jax.block_until_ready(out)

    ref = _reference(x, wq, bq, wk, bk, wv, bv)
    assert out.shape == (B, S, E)
    # bf16 MXU operands + approx reciprocal -> slightly looser tolerance than pure f32.
    assert jnp.allclose(out, ref, atol=3e-2, rtol=3e-2), float(jnp.max(jnp.abs(out - ref)))

    print("KERNEL_OK")
</pallas_src>

<mosaic_0001>
module attributes {stable_mosaic.version = 11 : i64} {
  func.func @_self_attention_kernel(%arg0: i32, %arg1: memref<1x8x32xf32, #tpu.memory_space<vmem>>, %arg2: memref<32x384xbf16, #tpu.memory_space<vmem>>, %arg3: memref<1x384xf32, #tpu.memory_space<vmem>>, %arg4: memref<1x8x32xf32, #tpu.memory_space<vmem>>) attributes {dimension_semantics = [#tpu.dimension_semantics<parallel>], iteration_bounds = array<i64: 2>, scalar_prefetch = 0 : i64, scratch_operands = 0 : i64, tpu.core_type = #tpu.core_type<tc>, window_params = [{transform_indices = @transform_0, window_bounds = array<i64: 1, 8, 32>}, {pipeline_mode = #tpu.pipeline_mode<synchronous>, transform_indices = @transform_1, window_bounds = array<i64: 32, 384>}, {pipeline_mode = #tpu.pipeline_mode<synchronous>, transform_indices = @transform_2, window_bounds = array<i64: 1, 384>}, {transform_indices = @transform_3, window_bounds = array<i64: 1, 8, 32>}]} {
    %c0 = arith.constant 0 : index
    %c0_0 = arith.constant 0 : index
    %c0_1 = arith.constant 0 : index
    %0 = vector.load %arg1[%c0, %c0_0, %c0_1] : memref<1x8x32xf32, #tpu.memory_space<vmem>>, vector<1x8x32xf32>
    %1 = arith.truncf %0 : vector<1x8x32xf32> to vector<1x8x32xbf16>
    %c0_2 = arith.constant 0 : index
    %c0_3 = arith.constant 0 : index
    %2 = vector.load %arg2[%c0_2, %c0_3] : memref<32x384xbf16, #tpu.memory_space<vmem>>, vector<32x384xbf16>
    %cst = arith.constant dense<0.000000e+00> : vector<1x8x384xf32>
    %3 = tpu.matmul %1, %2, %cst {dimension_numbers = #tpu.dot_dimension_numbers<[2], [0], [0, 1], [1], [0, 0, 0, 1, 1, 1], [], []>} : vector<1x8x32xbf16>, vector<32x384xbf16>, vector<1x8x384xf32> -> vector<1x8x384xf32>
    %c0_4 = arith.constant 0 : index
    %c0_5 = arith.constant 0 : index
    %4 = vector.load %arg3[%c0_4, %c0_5] : memref<1x384xf32, #tpu.memory_space<vmem>>, vector<1x384xf32>
    %5 = vector.shape_cast %4 : vector<1x384xf32> to vector<1x1x384xf32>
    %6 = vector.broadcast %5 : vector<1x1x384xf32> to vector<1x8x384xf32>
    %7 = arith.addf %3, %6 : vector<1x8x384xf32>
    %8 = arith.truncf %7 : vector<1x8x384xf32> to vector<1x8x384xbf16>
    %9 = vector.extract_strided_slice %8 {offsets = [0, 0, 0], sizes = [1, 8, 128], strides = [1, 1, 1]} : vector<1x8x384xbf16> to vector<1x8x128xbf16>
    %10 = vector.extract_strided_slice %8 {offsets = [0, 0, 128], sizes = [1, 8, 128], strides = [1, 1, 1]} : vector<1x8x384xbf16> to vector<1x8x128xbf16>
    %11 = vector.extract_strided_slice %8 {offsets = [0, 0, 256], sizes = [1, 8, 128], strides = [1, 1, 1]} : vector<1x8x384xbf16> to vector<1x8x128xbf16>
    %cst_6 = arith.constant dense<0.000000e+00> : vector<1x8x8xf32>
    %12 = tpu.matmul %9, %10, %cst_6 {dimension_numbers = #tpu.dot_dimension_numbers<[2], [2], [1], [1], [0, 0, 0, 1, 1, 1], [0], [0]>} : vector<1x8x128xbf16>, vector<1x8x128xbf16>, vector<1x8x8xf32> -> vector<1x8x8xf32>
    %cst_7 = arith.constant dense<0xFF800000> : vector<1x8xf32>
    %13 = vector.multi_reduction <maximumf>, %12, %cst_7 [2] : vector<1x8x8xf32> to vector<1x8xf32>
    %14 = vector.shape_cast %13 : vector<1x8xf32> to vector<1x8x1xf32>
    %15 = vector.broadcast %14 : vector<1x8x1xf32> to vector<1x8x8xf32>
    %16 = arith.subf %12, %15 : vector<1x8x8xf32>
    %17 = math.exp %16 : vector<1x8x8xf32>
    %cst_8 = arith.constant dense<0.000000e+00> : vector<1x8xf32>
    %18 = vector.multi_reduction <add>, %17, %cst_8 [2] : vector<1x8x8xf32> to vector<1x8xf32>
    %19 = vector.shape_cast %18 : vector<1x8xf32> to vector<1x8x1xf32>
    %20 = arith.truncf %17 : vector<1x8x8xf32> to vector<1x8x8xbf16>
    %cst_9 = arith.constant dense<0.000000e+00> : vector<1x8x128xf32>
    %21 = tpu.matmul %20, %11, %cst_9 {dimension_numbers = #tpu.dot_dimension_numbers<[2], [1], [1], [2], [0, 0, 0, 1, 1, 2], [0], [0]>} : vector<1x8x8xbf16>, vector<1x8x128xbf16>, vector<1x8x128xf32> -> vector<1x8x128xf32>
    %22 = tpu.reciprocal %19 {approx = true} : vector<1x8x1xf32> -> vector<1x8x1xf32>
    %23 = vector.broadcast %22 : vector<1x8x1xf32> to vector<1x8x128xf32>
    %24 = arith.mulf %21, %23 : vector<1x8x128xf32>
    %25 = vector.extract_strided_slice %24 {offsets = [0, 0, 0], sizes = [1, 8, 32], strides = [1, 1, 1]} : vector<1x8x128xf32> to vector<1x8x32xf32>
    %c0_10 = arith.constant 0 : index
    %c0_11 = arith.constant 0 : index
    %c0_12 = arith.constant 0 : index
    %26 = vector.load %arg4[%c0_10, %c0_11, %c0_12] : memref<1x8x32xf32, #tpu.memory_space<vmem>>, vector<1x8x32xf32>
    tpu.vector_store %arg4[%c0_10, %c0_11, %c0_12], %25 {strides = array<i32>} : memref<1x8x32xf32, #tpu.memory_space<vmem>>, vector<1x8x32xf32>,
    return
  }
  func.func @transform_0(%arg0: i32) -> (i32, i32, i32) {
    %c0_i32 = arith.constant 0 : i32
    %c0_i32_0 = arith.constant 0 : i32
    %c0_i32_1 = arith.constant 0 : i32
    return %arg0, %c0_i32, %c0_i32_0 : i32, i32, i32
  }
  func.func @transform_1(%arg0: i32) -> (i32, i32) {
    %c0_i32 = arith.constant 0 : i32
    %c0_i32_0 = arith.constant 0 : i32
    %c0_i32_1 = arith.constant 0 : i32
    return %c0_i32, %c0_i32_0 : i32, i32
  }
  func.func @transform_2(%arg0: i32) -> (i32, i32) {
    %c0_i32 = arith.constant 0 : i32
    %c0_i32_0 = arith.constant 0 : i32
    %c0_i32_1 = arith.constant 0 : i32
    return %c0_i32, %c0_i32_0 : i32, i32
  }
  func.func @transform_3(%arg0: i32) -> (i32, i32, i32) {
    %c0_i32 = arith.constant 0 : i32
    %c0_i32_0 = arith.constant 0 : i32
    %c0_i32_1 = arith.constant 0 : i32
    return %arg0, %c0_i32, %c0_i32_0 : i32, i32, i32
  }
}

module attributes {stable_mosaic.version = 11 : i64} {
  func.func @_self_attention_kernel(%arg0: i32, %arg1: memref<1x8x32xf32, #tpu.memory_space<vmem>>, %arg2: memref<32x384xbf16, #tpu.memory_space<vmem>>, %arg3: memref<1x384xf32, #tpu.memory_space<vmem>>, %arg4: memref<1x8x32xf32, #tpu.memory_space<vmem>>) attributes {dimension_semantics = [#tpu.dimension_semantics<parallel>], iteration_bounds = array<i64: 2>, scalar_prefetch = 0 : i64, scratch_operands = 0 : i64, tpu.core_type = #tpu.core_type<tc>, window_params = [{transform_indices = @transform_0, window_bounds = array<i64: 1, 8, 32>}, {pipeline_mode = #tpu.pipeline_mode<synchronous>, transform_indices = @transform_1, window_bounds = array<i64: 32, 384>}, {pipeline_mode = #tpu.pipeline_mode<synchronous>, transform_indices = @transform_2, window_bounds = array<i64: 1, 384>}, {transform_indices = @transform_3, window_bounds = array<i64: 1, 8, 32>}]} {
    %c0 = arith.constant 0 : index
    %c0_0 = arith.constant 0 : index
    %c0_1 = arith.constant 0 : index
    %0 = vector.load %arg1[%c0, %c0_0, %c0_1] : memref<1x8x32xf32, #tpu.memory_space<vmem>>, vector<1x8x32xf32>
    %1 = arith.truncf %0 : vector<1x8x32xf32> to vector<1x8x32xbf16>
    %c0_2 = arith.constant 0 : index
    %c0_3 = arith.constant 0 : index
    %2 = vector.load %arg2[%c0_2, %c0_3] : memref<32x384xbf16, #tpu.memory_space<vmem>>, vector<32x384xbf16>
    %cst = arith.constant dense<0.000000e+00> : vector<1x8x384xf32>
    %3 = tpu.matmul %1, %2, %cst {dimension_numbers = #tpu.dot_dimension_numbers<[2], [0], [0, 1], [1], [0, 0, 0, 1, 1, 1], [], []>} : vector<1x8x32xbf16>, vector<32x384xbf16>, vector<1x8x384xf32> -> vector<1x8x384xf32>
    %c0_4 = arith.constant 0 : index
    %c0_5 = arith.constant 0 : index
    %4 = vector.load %arg3[%c0_4, %c0_5] : memref<1x384xf32, #tpu.memory_space<vmem>>, vector<1x384xf32>
    %5 = vector.shape_cast %4 : vector<1x384xf32> to vector<1x1x384xf32>
    %6 = vector.broadcast %5 : vector<1x1x384xf32> to vector<1x8x384xf32>
    %7 = arith.addf %3, %6 : vector<1x8x384xf32>
    %8 = arith.truncf %7 : vector<1x8x384xf32> to vector<1x8x384xbf16>
    %9 = vector.extract_strided_slice %8 {offsets = [0, 0, 0], sizes = [1, 8, 128], strides = [1, 1, 1]} : vector<1x8x384xbf16> to vector<1x8x128xbf16>
    %10 = vector.extract_strided_slice %8 {offsets = [0, 0, 128], sizes = [1, 8, 128], strides = [1, 1, 1]} : vector<1x8x384xbf16> to vector<1x8x128xbf16>
    %11 = vector.extract_strided_slice %8 {offsets = [0, 0, 256], sizes = [1, 8, 128], strides = [1, 1, 1]} : vector<1x8x384xbf16> to vector<1x8x128xbf16>
    %cst_6 = arith.constant dense<0.000000e+00> : vector<1x8x8xf32>
    %12 = tpu.matmul %9, %10, %cst_6 {dimension_numbers = #tpu.dot_dimension_numbers<[2], [2], [1], [1], [0, 0, 0, 1, 1, 1], [0], [0]>} : vector<1x8x128xbf16>, vector<1x8x128xbf16>, vector<1x8x8xf32> -> vector<1x8x8xf32>
    %cst_7 = arith.constant dense<0xFF800000> : vector<1x8xf32>
    %13 = vector.multi_reduction <maximumf>, %12, %cst_7 [2] : vector<1x8x8xf32> to vector<1x8xf32>
    %14 = vector.shape_cast %13 : vector<1x8xf32> to vector<1x8x1xf32>
    %15 = vector.broadcast %14 : vector<1x8x1xf32> to vector<1x8x8xf32>
    %16 = arith.subf %12, %15 : vector<1x8x8xf32>
    %17 = math.exp %16 : vector<1x8x8xf32>
    %cst_8 = arith.constant dense<0.000000e+00> : vector<1x8xf32>
    %18 = vector.multi_reduction <add>, %17, %cst_8 [2] : vector<1x8x8xf32> to vector<1x8xf32>
    %19 = vector.shape_cast %18 : vector<1x8xf32> to vector<1x8x1xf32>
    %20 = arith.truncf %17 : vector<1x8x8xf32> to vector<1x8x8xbf16>
    %cst_9 = arith.constant dense<0.000000e+00> : vector<1x8x128xf32>
    %21 = tpu.matmul %20, %11, %cst_9 {dimension_numbers = #tpu.dot_dimension_numbers<[2], [1], [1], [2], [0, 0, 0, 1, 1, 2], [0], [0]>} : vector<1x8x8xbf16>, vector<1x8x128xbf16>, vector<1x8x128xf32> -> vector<1x8x128xf32>
    %22 = tpu.reciprocal %19 {approx = true} : vector<1x8x1xf32> -> vector<1x8x1xf32>
    %23 = vector.broadcast %22 : vector<1x8x1xf32> to vector<1x8x128xf32>
    %24 = arith.mulf %21, %23 : vector<1x8x128xf32>
    %25 = vector.extract_strided_slice %24 {offsets = [0, 0, 0], sizes = [1, 8, 32], strides = [1, 1, 1]} : vector<1x8x128xf32> to vector<1x8x32xf32>
    %c0_10 = arith.constant 0 : index
    %c0_11 = arith.constant 0 : index
    %c0_12 = arith.constant 0 : index
    %26 = vector.load %arg4[%c0_10, %c0_11, %c0_12] : memref<1x8x32xf32, #tpu.memory_space<vmem>>, vector<1x8x32xf32>
    tpu.vector_store %arg4[%c0_10, %c0_11, %c0_12], %25 {strides = array<i32>} : memref<1x8x32xf32, #tpu.memory_space<vmem>>, vector<1x8x32xf32>,
    return
  }
  func.func @transform_0(%arg0: i32) -> (i32, i32, i32) {
    %c0_i32 = arith.constant 0 : i32
    %c0_i32_0 = arith.constant 0 : i32
    %c0_i32_1 = arith.constant 0 : i32
    return %arg0, %c0_i32, %c0_i32_0 : i32, i32, i32
  }
  func.func @transform_1(%arg0: i32) -> (i32, i32) {
    %c0_i32 = arith.constant 0 : i32
    %c0_i32_0 = arith.constant 0 : i32
    %c0_i32_1 = arith.constant 0 : i32
    return %c0_i32, %c0_i32_0 : i32, i32
  }
  func.func @transform_2(%arg0: i32) -> (i32, i32) {
    %c0_i32 = arith.constant 0 : i32
    %c0_i32_0 = arith.constant 0 : i32
    %c0_i32_1 = arith.constant 0 : i32
    return %c0_i32, %c0_i32_0 : i32, i32
  }
  func.func @transform_3(%arg0: i32) -> (i32, i32, i32) {
    %c0_i32 = arith.constant 0 : i32
    %c0_i32_0 = arith.constant 0 : i32
    %c0_i32_1 = arith.constant 0 : i32
    return %arg0, %c0_i32, %c0_i32_0 : i32, i32, i32
  }
}

</mosaic_0001>

<bundles_post_ra>
// kernel: tpu_custom_call.1
= control target key start
LH: loop header
LB: loop body
LE: loop exit
PB: predicated region body
PF: predicated region fallthrough
CT: control target
= control target key end

     0   :  { %8 = vsyncpa [#allocation3], 0  ;;  %s1035_s0 = inlined_call_operand.hbm [shape: f32[2,8,32], index: 0, kind: input, shape index: {}]   ;;  %s1036_s1 = inlined_call_operand.hbm [shape: bf16[32,384], index: 1, kind: input, shape index: {}]   ;;  %s1037_s2 = inlined_call_operand.vmem [shape: f32[1,384], index: 2, kind: input, shape index: {}]   ;;  %s1038_s3 = inlined_call_operand.hbm [shape: f32[2,8,32], index: 3, kind: output, shape index: {}]  }
   0x1   :  { %10 = vsyncpa [#allocation3 + $0x1], 0 }
   0x2   :  { %11 = vsyncpa [#allocation6], 0 }
   0x3   :  { %12 = vsyncpa [#allocation4], 0 }
   0x4   :  { %14 = vsyncpa [#allocation4 + $0x1], 0  ;;  %s826_s12 = smov 0   ;;  %s828_s13 = smov 0  }
   0x5   :  { %s830_s14 = smov 0   ;;  %s832_s15 = smov 0  }
   0x6 LB: > { %s847_s16 = sadd.s32 4294967295, %s796_s15   ;;  %s544_s17 = sadd.s32 4294967294, %s796_s15   ;;  %s796_s15 = sphi %s832_s15, %s1058_s15   ;;  %s792_s14 = sphi %s830_s14, %s1057_s14   ;;  %s788_s13 = sphi %s828_s13, %s1056_s13   ;;  %s784_s12 = sphi %s826_s12, %s1055_s12  }
   0x7   : > { %p40_p0 = scmp.ne.s32.totalorder %s788_s13, %s784_s12  ;;  %p1039_p1 = scmp.eq.s32.totalorder %s847_s16, 0 }
   0x8   : > { %p112_p3 = scmp.eq.s32.totalorder %s544_s17, 1  ;;  %p545_p5 = scmp.ge.s32.totalorder %s796_s15, 1 }
   0x9   : > { %p856_p4 = por %p1039_p1, %p40_p0  ;;  %p119_p7 = scmp.lt.s32.totalorder %s796_s15, 3 }
   0xa   : > { %p861_p6 = por %p112_p3, %p40_p0  ;;  %s798_s21 = smov [#allocation5]  }
   0xb   : > { %s1042_s18 = scalar_select %p856_p4, 1, 0 }
   0xc   : > { %s1043_s19 = scalar_select %p861_p6, 1, 0 }
   0xd   : > { %p866_p8 = pnand %p545_p5, %p119_p7  ;;  %s131_s22 = sshll.u32 %s798_s21, 4  ;;  %s870_s22 = int_to_ptr.vmem [resolvable:$true] %s131_s22 }
   0xe   : > { %s882_s24 = sadd.s32 1, %s796_s15   ;;  %s27_s25 = sadd.s32 1, %s792_s14 }
   0xf   : > { %s1044_s20 = scalar_select %p866_p8, 1, 0 }
  0x10   : > { %p602_p9 = pneg %p866_p8  ;;  %s24_s26 = ssub.s32 %s796_s15, %s882_s24 }
  0x11   : > { %s668_s29 = scalar_lea.hbm %s1036_s1, 768 }
  0x12   : > { %p877_p11 = pnand %p602_p9, %p1039_p1  ;;  %p669_p12 = scmp.ne.s32.totalorder %s1036_s1, %s668_s29 }
  0x13   : > { %p675_p5 = scmp.lt.u32.totalorder %s668_s29, %s1036_s1 }
  0x14   : > { %p670_p13 = pneg %p877_p11 }
  0x16   : > { %p671_p0 = pnand %p670_p13, %p669_p12 }
  0x18   : > { %p672_p3 = pneg %p671_p0 }
  0x1a   : > { %p677_p7 = pnand %p675_p5, %p672_p3 }
  0x1c   : > { %680 = shalt.err (!%p677_p7)
}
  0x1d   : > { %s681_s7 = scalar_lea.vmem %s870_s22, 768  ;;  %p689_p2 = scmp.lt.s32.totalorder %s870_s22, %s870_s22 }
  0x1e   : > { %p682_p9 = scmp.ne.s32.totalorder %s870_s22, %s681_s7  ;;  %p690_p6 = scmp.lt.s32.totalorder %s681_s7, %s681_s7 }
  0x20   : > { %p684_p10 = pnand %p682_p9, %p670_p13  ;;  %p691_p4 = por %p690_p6, %p689_p2 }
  0x22   : > { %p685_p1 = pneg %p684_p10 }
  0x24   : > { %p692_p8 = pnand %p691_p4, %p685_p1 }
  0x26   : > { %695 = shalt.err (!%p692_p8)
}
  0x27   : > { %s799_s8 = smov 192   ;;  %s800_s9 = smov 12  }
  0x28   : > { %605 = dma.hbm_to_vmem [thread:$0]  (!%p877_p11), %s1036_s1, 768, %s870_s22, [#allocation6], %s799_s8, %s799_s8, %s800_s9  }
  0x29   : > { %p25_p2 = scmp.eq.s32.totalorder %s24_s26, 0  ;;  %p34_p1 = scmp.ne.s32.totalorder %s792_s14, %s788_s13 }
  0x2a   : > { %p35_p4 = scmp.eq.s32.totalorder %s796_s15, 0  ;;  %p615_p6 = scmp.lt.s32.totalorder %s796_s15, 2 }
  0x2b   : > { %s913_s17 = scalar_select %p25_p2, %s792_s14, %s27_s25  }
  0x2c   : > { %p36_p8 = por %p35_p4, %p34_p1  ;;  %p1046_p10 = scmp.eq.s32.totalorder %s847_s16, 1 }
  0x2d   : > { %s148_s27 = sand.u32 1, %s792_s14   ;;  %s549_s28 = sshll.u32 %s796_s15, 7 }
  0x2e   : > { %p917_p12 = por %p1046_p10, %p34_p1  ;;  %s548_s29 = sshll.u32 %s148_s27, 3 }
  0x2f   : > { %s926_s4 = scalar_lea.hbm %s1035_s0, %s549_s28  ;;  %s152_s22 = scalar_lea.vmem [#allocation2], %s548_s29 }
  0x30   : > { %s159_s25 = sshll.u32 %s152_s22, 4  ;;  %p928_p11 = pnand %p615_p6, %p36_p8  ;;  %s932_s25 = int_to_ptr.vmem [resolvable:$true] %s159_s25 }
  0x31   : > { %s149_s5 = scalar_lea.sflag [#allocation3], %s148_s27  ;;  %s696_s6 = scalar_lea.hbm %s926_s4, 128 }
  0x32   : > { %p697_p13 = scmp.ne.s32.totalorder %s926_s4, %s696_s6  ;;  %p698_p0 = pneg %p928_p11 }
  0x33   : > { %s701_s9 = scalar_lea.hbm %s1035_s0, 256  ;;  %p702_p7 = scmp.lt.u32.totalorder %s926_s4, %s1035_s0 }
  0x34   : > { %p699_p3 = pnand %p698_p0, %p697_p13  ;;  %p703_p9 = scmp.lt.u32.totalorder %s701_s9, %s696_s6 }
  0x35   : > { %p705_p1 = scmp.lt.u32.totalorder %s696_s6, %s926_s4 }
  0x36   : > { %p700_p5 = pneg %p699_p3  ;;  %p704_p2 = por %p703_p9, %p702_p7 }
  0x38   : > { %p706_p4 = por %p705_p1, %p704_p2 }
  0x3a   : > { %p707_p6 = pnand %p706_p4, %p700_p5 }
  0x3c   : > { %710 = shalt.err (!%p707_p6)
}
  0x3d   : > { %s711_s27 = scalar_lea.vmem %s932_s25, 128  ;;  %s801_s28 = smov [#allocation2]  }
  0x3e   : > { %p712_p8 = scmp.ne.s32.totalorder %s932_s25, %s711_s27  ;;  %s716_s29 = sshll.u32 %s801_s28, 4  ;;  %s717_s29 = int_to_ptr.vmem [resolvable:$false] %s716_s29 }
  0x3f   : > { %s718_s23 = scalar_lea.vmem %s717_s29, 256  ;;  %p719_p3 = scmp.lt.s32.totalorder %s932_s25, %s717_s29 }
  0x40   : > { %p714_p10 = pnand %p712_p8, %p698_p0  ;;  %p720_p7 = scmp.lt.s32.totalorder %s718_s23, %s711_s27 }
  0x42   : > { %p715_p13 = pneg %p714_p10  ;;  %p721_p9 = por %p720_p7, %p719_p3 }
  0x44   : > { %p722_p2 = pnand %p721_p9, %p715_p13 }
  0x46   : > { %725 = shalt.err (!%p722_p2)
}
  0x47   : > { %609 = dma.hbm_to_vmem [thread:$0]  (!%p928_p11), %s926_s4, 128, %s932_s25, %s149_s5  }
  0x48   : > { %p1049_p5 = scmp.ne.s32.totalorder %s1044_s20, 0 }
  0x49   : > { %s962_s30 = sand.u32 (!%p1049_p5), 1, %s788_s13   ;;  %p1050_p0 = scmp.ne.s32.totalorder (!%p1049_p5), %s1042_s18, 0 }
  0x4a   : > { %168 = sbr.rel (%p1049_p5) target bundleno = 918 (0x396), region = 32  ;;  %s551_s22 = sshll.u32 (!%p1049_p5), %s962_s30, 3 }
  0x4b   : > { %s171_s6 = scalar_lea.sflag (!%p1049_p5), [#allocation3], %s962_s30  ;;  %s174_s7 = scalar_lea.vmem (!%p1049_p5), [#allocation2], %s551_s22 }
  0x51   : > { %771 = dma.done.wait (%p1050_p0), %s171_s6, 128  }
  0x52   : > { %773 = vsyncadd (%p1050_p0), %s171_s6, 4294967168  ;;  %p1051_p11 = scmp.eq.s32.totalorder %s847_s16, 0 }
  0x54   : > { %775 = dma.done.wait (%p1051_p11), [#allocation6], 768   ;;  %p1052_p1 = pmov %p1051_p11 }
  0x55   : > { %v802_v0 = vmov 0   ;;  %v656_v1 = vld [vmem:[#allocation5 + $0x4] ss:$12 sps:$4 sm:$0xff]   ;;  %v658_v2 = vld [vmem:[#allocation5] ss:$12 sps:$4 sm:$0xff]   ;;  %vm261_vm0 = vcmask 261120   ;;  %v214_v10 = vlaneseq }
  0x56   : > { %777 = vsyncadd (%p1052_p1), [#allocation6], 4294966528  ;;  %297 = vmatprep.mubr.bf16.mxu0 %v802_v0  ;;  %265 = vmatprep.subr.bf16.mxu0 %v656_v1  ;;  %v659_v3 = vld [vmem:[#allocation5 + $0x1c] ss:$12 sps:$4 sm:$0xff]   ;;  %v661_v4 = vld [vmem:[#allocation5 + $0x18] ss:$12 sps:$4 sm:$0xff]  }
  0x57   : > { %266 = vmatpush1.bf16.msra.mxu0 %v658_v2  ;;  %v202_v5 = vld [vmem:[%s174_s7] sm:$0xff]  ;;  %v803_v7 = vmov 0.0   ;;  %vm804_vm1 = vmmov 0   ;;  %v663_v9 = vld [vmem:[#allocation5 + $0x20] ss:$12 sps:$4 sm:$0xff]   ;;  %v215_v11 = vshrl.u32 %v214_v10, 7 }
  0x58   : > { %267 = vmatprep.subr.bf16.mxu0 %v659_v3  ;;  %v203_v6 = vpack.c.bf16 %v202_v5, %v202_v5  ;;  %574 = vmatprep.subr.bf16.mxu1 %v803_v7  ;;  %v662_v8 = vld [vmem:[#allocation5 + $0x8] ss:$12 sps:$4 sm:$0xff]   ;;  %v212_v13 = vld [vmem:[%s1037_s2] sm:$0x7]  ;;  %vm389_vm2 = vcmask 64512   ;;  %vm403_vm3 = vcmask 1043456  }
  0x59   : > { %578 = vmatprep.mubr.msk.bf16.mxu1 %vm804_vm1, %v803_v7  ;;  %575 = vmatpush3.bf16.msra.mxu1 %v662_v8  ;;  %v220_v12 = vsub.s32 1, %v215_v11  ;;  %v216_v15 = vsub.s32 0, %v215_v11  ;;  %v224_v30 = vsub.s32 2, %v215_v11  ;;  %s564_s4 = sshll.u32 %s847_s16, 7  ;;  %s200_s25 = scalar_lea.vmem [#allocation7], %s551_s22 }
  0x5a   : > { %576 = vmatprep.subr.bf16.mxu1 %v803_v7  ;;  %s464_s26 = sshll.u32 %s200_s25, 4  ;;  %s990_s9 = scalar_lea.hbm %s1038_s3, %s564_s4  ;;  %s992_s26 = int_to_ptr.vmem [resolvable:$true] %s464_s26 }
  0x5b   : > { %268 = vmatpush1.bf16.msra.mxu0 %v661_v4  ;;  %v221_v14 = vrot.slane %v212_v13, %v220_v12  ;;  %v217_v20 = vrot.slane %v212_v13, %v216_v15  ;;  %v225_v33 = vrot.slane %v212_v13, %v224_v30  ;;  %s451_s16 = scalar_lea.sflag [#allocation4], %s962_s30  ;;  %s726_s10 = scalar_lea.vmem %s992_s26, 128 }
  0x5c   : > { %582 = vmatprep.subr.bf16.mxu0 %v803_v7  ;;  %p727_p4 = scmp.ne.s32.totalorder %s992_s26, %s726_s10  ;;  %s805_s11 = smov [#allocation7]  }
  0x5d   : > { %577 = vmatpush3.bf16.msra.mxu1 %v663_v9  ;;  %s730_s27 = sshll.u32 %s805_s11, 4  ;;  %s731_s27 = int_to_ptr.vmem [resolvable:$false] %s730_s27 }
  0x5e   : > { %560 = vmatmul.mubr.msk.bf16.vlgmr.msra.gmra.mrb[0].mxu0 %vm261_vm0, %v203_v6  ;;  %588 = vmatprep.subr.bf16.mxu1 %v803_v7  ;;  %p728_p6 = pnand %p727_p4, %p917_p12  ;;  %s732_s28 = scalar_lea.vmem %s731_s27, 256 }
  0x5f   : > { %584 = vmatprep.mubr.msk.bf16.mxu0 %vm804_vm1, %v803_v7  ;;  %p733_p10 = scmp.lt.s32.totalorder %s992_s26, %s731_s27  ;;  %p734_p13 = scmp.lt.s32.totalorder %s732_s28, %s726_s10 }
  0x60   : > { %579 = vmatmul.mubr.msk.bf16.vlgmr.msra.gmra.mrb[0].mxu1 %vm261_vm0, %v203_v6  ;;  %p729_p8 = pneg %p728_p6 }
  0x61   : > { %590 = vmatprep.mubr.msk.bf16.mxu1 %vm804_vm1, %v803_v7  ;;  %p735_p3 = por %p734_p13, %p733_p10 }
  0x63   : > { %p736_p7 = pnand %p735_p3, %p729_p8 }
 0x131   : > { %v299_v16 = vpop.f32.mrb[0].mxu0 }
 0x132   : > { %v301_v17 = vpop.f32.mrb[1].mxu0  ;;  %v300_v23 = vadd.f32 %v299_v16, %v217_v20 }
 0x133   : > { %v302_v18 = vadd.f32 %v301_v17, %v221_v14  ;;  %v303_v19 = vpop.f32.mrb[2].mxu0  ;;  %v340_v31 = vpop.f32.mrb[0].mxu1 }
 0x134   : > { %v304_v21 = vpop.f32.mrb[3].mxu0  ;;  %v346_v24 = vpack.c.bf16 %v300_v23, %v300_v23  ;;  %v580_v32 = vpop.f32.mrb[1].mxu1  ;;  %v341_v36 = vadd.f32 %v340_v31, %v225_v33 }
 0x135   : > { %v347_v22 = vpack.c.bf16 %v302_v18, %v302_v18  ;;  %v343_v34 = vpop.f32.mrb[2].mxu1 }
 0x136   : > { %v581_v35 = vpop.f32.mrb[3].mxu1  ;;  %v348_v37 = vpack.c.bf16 %v341_v36, %v341_v36 }
 0x137   : > { %583 = vmatpush3.bf16.xpose.msra.mxu0 %v347_v22 }
 0x138   : > { %v405_v38 = vsel %vm403_vm3, %v348_v37, 0 }
 0x139   : > { %589 = vmatpush3.bf16.msra.mxu1 %v405_v38 }
 0x13e   : > { %585 = vmatmul.mubr.bf16.vlgmr.msra.gmra.mrb[4].mxu0 %v346_v24 }
 0x211   : > { %v383_v25 = vpop.f32.mrb[4].mxu0 }
 0x212   : > { %v586_v26 = vpop.f32.mrb[5].mxu0  ;;  %v390_v27 = vsel %vm389_vm2, %v383_v25, -inf }
 0x213   : > { %391 = vmax.xlane.f32.xlu0 %v390_v27  ;;  %v386_v28 = vpop.f32.mrb[6].mxu0 }
 0x214   : > { %v587_v29 = vpop.f32.mrb[7].mxu0 }
 0x2a0   : > { %v392_v39 = vpop.xlane.xlu0 %391 }
 0x2a1   : > { %v393_v40 = vsub.f32 %v383_v25, %v392_v39 }
 0x2a3   : > { %v394_v41 = vmul.f32 1.442695, %v393_v40 }
 0x2a5   : > { %664 = vpow2.f32 %v394_v41 }
 0x2af   : > { %v665_v42 = vpop.eup %664 }
 0x2b0   : > { %v396_v43 = vsel %vm389_vm2, %v665_v42, 0.0  ;;  %v399_v44 = vpack.c.bf16 %v665_v42, %v665_v42 }
 0x2b1   : > { %397 = vadd.xlane.f32.xlu0 %v396_v43 }
 0x2b2   : > { %591 = vmatmul.mubr.msk.bf16.vlgmr.msra.gmra.mrb[4].mxu1 %vm389_vm2, %v399_v44 }
 0x33e   : > { %v398_v45 = vpop.xlane.xlu0 %397 }
 0x33f   : > { %666 = vrcp.f32 %v398_v45 }
 0x349   : > { %v667_v46 = vpop.eup %666 }
 0x385   : > { %v441_v47 = vpop.f32.mrb[4].mxu1 }
 0x386   : > { %v448_v48 = vmul.f32 %v667_v46, %v441_v47  ;;  %v592_v49 = vpop.f32.mrb[5].mxu1 }
 0x387   : > { %v444_v50 = vpop.f32.mrb[6].mxu1 }
 0x388   : > { %v593_v51 = vpop.f32.mrb[7].mxu1  ;;  %449 = vst.msk [vmem:[%s200_s25] sm:$0xff] %vm261_vm0, %v448_v48 }
 0x389   : > { %739 = shalt.err (!%p736_p7)
}
 0x38a   : > { %s740_s29 = scalar_lea.hbm %s990_s9, 128  ;;  %s744_s22 = scalar_lea.hbm %s1038_s3, 256 }
 0x38b   : > { %p741_p9 = scmp.ne.s32.totalorder %s990_s9, %s740_s29  ;;  %p745_p0 = scmp.lt.u32.totalorder %s990_s9, %s1038_s3 }
 0x38c   : > { %p746_p11 = scmp.lt.u32.totalorder %s744_s22, %s740_s29  ;;  %p748_p4 = scmp.lt.u32.totalorder %s740_s29, %s990_s9 }
 0x38d   : > { %p742_p2 = pnand %p741_p9, %p917_p12 }
 0x38e   : > { %p747_p1 = por %p746_p11, %p745_p0 }
 0x38f   : > { %p743_p5 = pneg %p742_p2 }
 0x390   : > { %p749_p6 = por %p748_p4, %p747_p1 }
 0x392   : > { %p750_p8 = pnand %p749_p6, %p743_p5 }
 0x394   : > { %753 = shalt.err (!%p750_p8)
}
 0x395   : > { %600 = dma.vmem_to_hbm [thread:$0]  (%p917_p12), %s992_s26, 128, %s990_s9, %s451_s16  }
 0x396 PF: > { %s476_s18 = sand.u32 1, %s784_s12   ;;  %p1053_p10 = scmp.ne.s32.totalorder %s1043_s19, 0 }
 0x397   : > { %p1054_p13 = scmp.ge.s32.totalorder %s796_s15, 2  ;;  %s477_s20 = scalar_lea.sflag [#allocation4], %s476_s18 }
 0x399   : > { %p611_p3 = pnand %p1054_p13, %p1053_p10 }
 0x39b   : > { %779 = dma.done.wait (!%p611_p3), %s477_s20, 128  }
 0x39c   : > { %781 = vsyncadd (!%p611_p3), %s477_s20, 4294967168  ;;  %p17_p7 = scmp.ge.s32.totalorder %s882_s24, 4   ;;  %s1055_s12 = smov %s788_s13 }
 0x39d   : > { %s1056_s13 = smov %s792_s14  ;;  %s1057_s14 = smov %s913_s17 }
 0x39e   : > { %s1058_s15 = smov %s882_s24  ;;  %19 = sbr.rel (!%p17_p7) target bundleno = 6 (0x6), region = 81 }
 0x3a5   :  { %482 = vsyncpa [#allocation3], 1 }
 0x3a6   :  { %484 = vsyncpa [#allocation3 + $0x1], 1 }
 0x3a7   :  { %485 = vsyncpa [#allocation6], 1 }
 0x3a8   :  { %486 = vsyncpa [#allocation4], 1 }
 0x3a9   :  { %488 = vsyncpa [#allocation4 + $0x1], 1 }

// kernel: tpu_custom_call.1
= control target key start
LH: loop header
LB: loop body
LE: loop exit
PB: predicated region body
PF: predicated region fallthrough
CT: control target
= control target key end

     0   :  { %8 = vsyncpa [#allocation3], 0  ;;  %s1035_s0 = inlined_call_operand.hbm [shape: f32[2,8,32], index: 0, kind: input, shape index: {}]   ;;  %s1036_s1 = inlined_call_operand.hbm [shape: bf16[32,384], index: 1, kind: input, shape index: {}]   ;;  %s1037_s2 = inlined_call_operand.vmem [shape: f32[1,384], index: 2, kind: input, shape index: {}]   ;;  %s1038_s3 = inlined_call_operand.hbm [shape: f32[2,8,32], index: 3, kind: output, shape index: {}]  }
   0x1   :  { %10 = vsyncpa [#allocation3 + $0x1], 0 }
   0x2   :  { %11 = vsyncpa [#allocation6], 0 }
   0x3   :  { %12 = vsyncpa [#allocation4], 0 }
   0x4   :  { %14 = vsyncpa [#allocation4 + $0x1], 0  ;;  %s826_s12 = smov 0   ;;  %s828_s13 = smov 0  }
   0x5   :  { %s830_s14 = smov 0   ;;  %s832_s15 = smov 0  }
   0x6 LB: > { %s847_s16 = sadd.s32 4294967295, %s796_s15   ;;  %s544_s17 = sadd.s32 4294967294, %s796_s15   ;;  %s796_s15 = sphi %s832_s15, %s1058_s15   ;;  %s792_s14 = sphi %s830_s14, %s1057_s14   ;;  %s788_s13 = sphi %s828_s13, %s1056_s13   ;;  %s784_s12 = sphi %s826_s12, %s1055_s12  }
   0x7   : > { %p40_p0 = scmp.ne.s32.totalorder %s788_s13, %s784_s12  ;;  %p1039_p1 = scmp.eq.s32.totalorder %s847_s16, 0 }
   0x8   : > { %p112_p3 = scmp.eq.s32.totalorder %s544_s17, 1  ;;  %p545_p5 = scmp.ge.s32.totalorder %s796_s15, 1 }
   0x9   : > { %p856_p4 = por %p1039_p1, %p40_p0  ;;  %p119_p7 = scmp.lt.s32.totalorder %s796_s15, 3 }
   0xa   : > { %p861_p6 = por %p112_p3, %p40_p0  ;;  %s798_s21 = smov [#allocation5]  }
   0xb   : > { %s1042_s18 = scalar_select %p856_p4, 1, 0 }
   0xc   : > { %s1043_s19 = scalar_select %p861_p6, 1, 0 }
   0xd   : > { %p866_p8 = pnand %p545_p5, %p119_p7  ;;  %s131_s22 = sshll.u32 %s798_s21, 4  ;;  %s870_s22 = int_to_ptr.vmem [resolvable:$true] %s131_s22 }
   0xe   : > { %s882_s24 = sadd.s32 1, %s796_s15   ;;  %s27_s25 = sadd.s32 1, %s792_s14 }
   0xf   : > { %s1044_s20 = scalar_select %p866_p8, 1, 0 }
  0x10   : > { %p602_p9 = pneg %p866_p8  ;;  %s24_s26 = ssub.s32 %s796_s15, %s882_s24 }
  0x11   : > { %s668_s29 = scalar_lea.hbm %s1036_s1, 768 }
  0x12   : > { %p877_p11 = pnand %p602_p9, %p1039_p1  ;;  %p669_p12 = scmp.ne.s32.totalorder %s1036_s1, %s668_s29 }
  0x13   : > { %p675_p5 = scmp.lt.u32.totalorder %s668_s29, %s1036_s1 }
  0x14   : > { %p670_p13 = pneg %p877_p11 }
  0x16   : > { %p671_p0 = pnand %p670_p13, %p669_p12 }
  0x18   : > { %p672_p3 = pneg %p671_p0 }
  0x1a   : > { %p677_p7 = pnand %p675_p5, %p672_p3 }
  0x1c   : > { %680 = shalt.err (!%p677_p7)
}
  0x1d   : > { %s681_s7 = scalar_lea.vmem %s870_s22, 768  ;;  %p689_p2 = scmp.lt.s32.totalorder %s870_s22, %s870_s22 }
  0x1e   : > { %p682_p9 = scmp.ne.s32.totalorder %s870_s22, %s681_s7  ;;  %p690_p6 = scmp.lt.s32.totalorder %s681_s7, %s681_s7 }
  0x20   : > { %p684_p10 = pnand %p682_p9, %p670_p13  ;;  %p691_p4 = por %p690_p6, %p689_p2 }
  0x22   : > { %p685_p1 = pneg %p684_p10 }
  0x24   : > { %p692_p8 = pnand %p691_p4, %p685_p1 }
  0x26   : > { %695 = shalt.err (!%p692_p8)
}
  0x27   : > { %s799_s8 = smov 192   ;;  %s800_s9 = smov 12  }
  0x28   : > { %605 = dma.hbm_to_vmem [thread:$0]  (!%p877_p11), %s1036_s1, 768, %s870_s22, [#allocation6], %s799_s8, %s799_s8, %s800_s9  }
  0x29   : > { %p25_p2 = scmp.eq.s32.totalorder %s24_s26, 0  ;;  %p34_p1 = scmp.ne.s32.totalorder %s792_s14, %s788_s13 }
  0x2a   : > { %p35_p4 = scmp.eq.s32.totalorder %s796_s15, 0  ;;  %p615_p6 = scmp.lt.s32.totalorder %s796_s15, 2 }
  0x2b   : > { %s913_s17 = scalar_select %p25_p2, %s792_s14, %s27_s25  }
  0x2c   : > { %p36_p8 = por %p35_p4, %p34_p1  ;;  %p1046_p10 = scmp.eq.s32.totalorder %s847_s16, 1 }
  0x2d   : > { %s148_s27 = sand.u32 1, %s792_s14   ;;  %s549_s28 = sshll.u32 %s796_s15, 7 }
  0x2e   : > { %p917_p12 = por %p1046_p10, %p34_p1  ;;  %s548_s29 = sshll.u32 %s148_s27, 3 }
  0x2f   : > { %s926_s4 = scalar_lea.hbm %s1035_s0, %s549_s28  ;;  %s152_s22 = scalar_lea.vmem [#allocation2], %s548_s29 }
  0x30   : > { %s159_s25 = sshll.u32 %s152_s22, 4  ;;  %p928_p11 = pnand %p615_p6, %p36_p8  ;;  %s932_s25 = int_to_ptr.vmem [resolvable:$true] %s159_s25 }
  0x31   : > { %s149_s5 = scalar_lea.sflag [#allocation3], %s148_s27  ;;  %s696_s6 = scalar_lea.hbm %s926_s4, 128 }
  0x32   : > { %p697_p13 = scmp.ne.s32.totalorder %s926_s4, %s696_s6  ;;  %p698_p0 = pneg %p928_p11 }
  0x33   : > { %s701_s9 = scalar_lea.hbm %s1035_s0, 256  ;;  %p702_p7 = scmp.lt.u32.totalorder %s926_s4, %s1035_s0 }
  0x34   : > { %p699_p3 = pnand %p698_p0, %p697_p13  ;;  %p703_p9 = scmp.lt.u32.totalorder %s701_s9, %s696_s6 }
  0x35   : > { %p705_p1 = scmp.lt.u32.totalorder %s696_s6, %s926_s4 }
  0x36   : > { %p700_p5 = pneg %p699_p3  ;;  %p704_p2 = por %p703_p9, %p702_p7 }
  0x38   : > { %p706_p4 = por %p705_p1, %p704_p2 }
  0x3a   : > { %p707_p6 = pnand %p706_p4, %p700_p5 }
  0x3c   : > { %710 = shalt.err (!%p707_p6)
}
  0x3d   : > { %s711_s27 = scalar_lea.vmem %s932_s25, 128  ;;  %s801_s28 = smov [#allocation2]  }
  0x3e   : > { %p712_p8 = scmp.ne.s32.totalorder %s932_s25, %s711_s27  ;;  %s716_s29 = sshll.u32 %s801_s28, 4  ;;  %s717_s29 = int_to_ptr.vmem [resolvable:$false] %s716_s29 }
  0x3f   : > { %s718_s23 = scalar_lea.vmem %s717_s29, 256  ;;  %p719_p3 = scmp.lt.s32.totalorder %s932_s25, %s717_s29 }
  0x40   : > { %p714_p10 = pnand %p712_p8, %p698_p0  ;;  %p720_p7 = scmp.lt.s32.totalorder %s718_s23, %s711_s27 }
  0x42   : > { %p715_p13 = pneg %p714_p10  ;;  %p721_p9 = por %p720_p7, %p719_p3 }
  0x44   : > { %p722_p2 = pnand %p721_p9, %p715_p13 }
  0x46   : > { %725 = shalt.err (!%p722_p2)
}
  0x47   : > { %609 = dma.hbm_to_vmem [thread:$0]  (!%p928_p11), %s926_s4, 128, %s932_s25, %s149_s5  }
  0x48   : > { %p1049_p5 = scmp.ne.s32.totalorder %s1044_s20, 0 }
  0x49   : > { %s962_s30 = sand.u32 (!%p1049_p5), 1, %s788_s13   ;;  %p1050_p0 = scmp.ne.s32.totalorder (!%p1049_p5), %s1042_s18, 0 }
  0x4a   : > { %168 = sbr.rel (%p1049_p5) target bundleno = 918 (0x396), region = 32  ;;  %s551_s22 = sshll.u32 (!%p1049_p5), %s962_s30, 3 }
  0x4b   : > { %s171_s6 = scalar_lea.sflag (!%p1049_p5), [#allocation3], %s962_s30  ;;  %s174_s7 = scalar_lea.vmem (!%p1049_p5), [#allocation2], %s551_s22 }
  0x51   : > { %771 = dma.done.wait (%p1050_p0), %s171_s6, 128  }
  0x52   : > { %773 = vsyncadd (%p1050_p0), %s171_s6, 4294967168  ;;  %p1051_p11 = scmp.eq.s32.totalorder %s847_s16, 0 }
  0x54   : > { %775 = dma.done.wait (%p1051_p11), [#allocation6], 768   ;;  %p1052_p1 = pmov %p1051_p11 }
  0x55   : > { %v802_v0 = vmov 0   ;;  %v656_v1 = vld [vmem:[#allocation5 + $0x4] ss:$12 sps:$4 sm:$0xff]   ;;  %v658_v2 = vld [vmem:[#allocation5] ss:$12 sps:$4 sm:$0xff]   ;;  %vm261_vm0 = vcmask 261120   ;;  %v214_v10 = vlaneseq }
  0x56   : > { %777 = vsyncadd (%p1052_p1), [#allocation6], 4294966528  ;;  %297 = vmatprep.mubr.bf16.mxu0 %v802_v0  ;;  %265 = vmatprep.subr.bf16.mxu0 %v656_v1  ;;  %v659_v3 = vld [vmem:[#allocation5 + $0x1c] ss:$12 sps:$4 sm:$0xff]   ;;  %v661_v4 = vld [vmem:[#allocation5 + $0x18] ss:$12 sps:$4 sm:$0xff]  }
  0x57   : > { %266 = vmatpush1.bf16.msra.mxu0 %v658_v2  ;;  %v202_v5 = vld [vmem:[%s174_s7] sm:$0xff]  ;;  %v803_v7 = vmov 0.0   ;;  %vm804_vm1 = vmmov 0   ;;  %v663_v9 = vld [vmem:[#allocation5 + $0x20] ss:$12 sps:$4 sm:$0xff]   ;;  %v215_v11 = vshrl.u32 %v214_v10, 7 }
  0x58   : > { %267 = vmatprep.subr.bf16.mxu0 %v659_v3  ;;  %v203_v6 = vpack.c.bf16 %v202_v5, %v202_v5  ;;  %574 = vmatprep.subr.bf16.mxu1 %v803_v7  ;;  %v662_v8 = vld [vmem:[#allocation5 + $0x8] ss:$12 sps:$4 sm:$0xff]   ;;  %v212_v13 = vld [vmem:[%s1037_s2] sm:$0x7]  ;;  %vm389_vm2 = vcmask 64512   ;;  %vm403_vm3 = vcmask 1043456  }
  0x59   : > { %578 = vmatprep.mubr.msk.bf16.mxu1 %vm804_vm1, %v803_v7  ;;  %575 = vmatpush3.bf16.msra.mxu1 %v662_v8  ;;  %v220_v12 = vsub.s32 1, %v215_v11  ;;  %v216_v15 = vsub.s32 0, %v215_v11  ;;  %v224_v30 = vsub.s32 2, %v215_v11  ;;  %s564_s4 = sshll.u32 %s847_s16, 7  ;;  %s200_s25 = scalar_lea.vmem [#allocation7], %s551_s22 }
  0x5a   : > { %576 = vmatprep.subr.bf16.mxu1 %v803_v7  ;;  %s464_s26 = sshll.u32 %s200_s25, 4  ;;  %s990_s9 = scalar_lea.hbm %s1038_s3, %s564_s4  ;;  %s992_s26 = int_to_ptr.vmem [resolvable:$true] %s464_s26 }
  0x5b   : > { %268 = vmatpush1.bf16.msra.mxu0 %v661_v4  ;;  %v221_v14 = vrot.slane %v212_v13, %v220_v12  ;;  %v217_v20 = vrot.slane %v212_v13, %v216_v15  ;;  %v225_v33 = vrot.slane %v212_v13, %v224_v30  ;;  %s451_s16 = scalar_lea.sflag [#allocation4], %s962_s30  ;;  %s726_s10 = scalar_lea.vmem %s992_s26, 128 }
  0x5c   : > { %582 = vmatprep.subr.bf16.mxu0 %v803_v7  ;;  %p727_p4 = scmp.ne.s32.totalorder %s992_s26, %s726_s10  ;;  %s805_s11 = smov [#allocation7]  }
  0x5d   : > { %577 = vmatpush3.bf16.msra.mxu1 %v663_v9  ;;  %s730_s27 = sshll.u32 %s805_s11, 4  ;;  %s731_s27 = int_to_ptr.vmem [resolvable:$false] %s730_s27 }
  0x5e   : > { %560 = vmatmul.mubr.msk.bf16.vlgmr.msra.gmra.mrb[0].mxu0 %vm261_vm0, %v203_v6  ;;  %588 = vmatprep.subr.bf16.mxu1 %v803_v7  ;;  %p728_p6 = pnand %p727_p4, %p917_p12  ;;  %s732_s28 = scalar_lea.vmem %s731_s27, 256 }
  0x5f   : > { %584 = vmatprep.mubr.msk.bf16.mxu0 %vm804_vm1, %v803_v7  ;;  %p733_p10 = scmp.lt.s32.totalorder %s992_s26, %s731_s27  ;;  %p734_p13 = scmp.lt.s32.totalorder %s732_s28, %s726_s10 }
  0x60   : > { %579 = vmatmul.mubr.msk.bf16.vlgmr.msra.gmra.mrb[0].mxu1 %vm261_vm0, %v203_v6  ;;  %p729_p8 = pneg %p728_p6 }
  0x61   : > { %590 = vmatprep.mubr.msk.bf16.mxu1 %vm804_vm1, %v803_v7  ;;  %p735_p3 = por %p734_p13, %p733_p10 }
  0x63   : > { %p736_p7 = pnand %p735_p3, %p729_p8 }
 0x131   : > { %v299_v16 = vpop.f32.mrb[0].mxu0 }
 0x132   : > { %v301_v17 = vpop.f32.mrb[1].mxu0  ;;  %v300_v23 = vadd.f32 %v299_v16, %v217_v20 }
 0x133   : > { %v302_v18 = vadd.f32 %v301_v17, %v221_v14  ;;  %v303_v19 = vpop.f32.mrb[2].mxu0  ;;  %v340_v31 = vpop.f32.mrb[0].mxu1 }
 0x134   : > { %v304_v21 = vpop.f32.mrb[3].mxu0  ;;  %v346_v24 = vpack.c.bf16 %v300_v23, %v300_v23  ;;  %v580_v32 = vpop.f32.mrb[1].mxu1  ;;  %v341_v36 = vadd.f32 %v340_v31, %v225_v33 }
 0x135   : > { %v347_v22 = vpack.c.bf16 %v302_v18, %v302_v18  ;;  %v343_v34 = vpop.f32.mrb[2].mxu1 }
 0x136   : > { %v581_v35 = vpop.f32.mrb[3].mxu1  ;;  %v348_v37 = vpack.c.bf16 %v341_v36, %v341_v36 }
 0x137   : > { %583 = vmatpush3.bf16.xpose.msra.mxu0 %v347_v22 }
 0x138   : > { %v405_v38 = vsel %vm403_vm3, %v348_v37, 0 }
 0x139   : > { %589 = vmatpush3.bf16.msra.mxu1 %v405_v38 }
 0x13e   : > { %585 = vmatmul.mubr.bf16.vlgmr.msra.gmra.mrb[4].mxu0 %v346_v24 }
 0x211   : > { %v383_v25 = vpop.f32.mrb[4].mxu0 }
 0x212   : > { %v586_v26 = vpop.f32.mrb[5].mxu0  ;;  %v390_v27 = vsel %vm389_vm2, %v383_v25, -inf }
 0x213   : > { %391 = vmax.xlane.f32.xlu0 %v390_v27  ;;  %v386_v28 = vpop.f32.mrb[6].mxu0 }
 0x214   : > { %v587_v29 = vpop.f32.mrb[7].mxu0 }
 0x2a0   : > { %v392_v39 = vpop.xlane.xlu0 %391 }
 0x2a1   : > { %v393_v40 = vsub.f32 %v383_v25, %v392_v39 }
 0x2a3   : > { %v394_v41 = vmul.f32 1.442695, %v393_v40 }
 0x2a5   : > { %664 = vpow2.f32 %v394_v41 }
 0x2af   : > { %v665_v42 = vpop.eup %664 }
 0x2b0   : > { %v396_v43 = vsel %vm389_vm2, %v665_v42, 0.0  ;;  %v399_v44 = vpack.c.bf16 %v665_v42, %v665_v42 }
 0x2b1   : > { %397 = vadd.xlane.f32.xlu0 %v396_v43 }
 0x2b2   : > { %591 = vmatmul.mubr.msk.bf16.vlgmr.msra.gmra.mrb[4].mxu1 %vm389_vm2, %v399_v44 }
 0x33e   : > { %v398_v45 = vpop.xlane.xlu0 %397 }
 0x33f   : > { %666 = vrcp.f32 %v398_v45 }
 0x349   : > { %v667_v46 = vpop.eup %666 }
 0x385   : > { %v441_v47 = vpop.f32.mrb[4].mxu1 }
 0x386   : > { %v448_v48 = vmul.f32 %v667_v46, %v441_v47  ;;  %v592_v49 = vpop.f32.mrb[5].mxu1 }
 0x387   : > { %v444_v50 = vpop.f32.mrb[6].mxu1 }
 0x388   : > { %v593_v51 = vpop.f32.mrb[7].mxu1  ;;  %449 = vst.msk [vmem:[%s200_s25] sm:$0xff] %vm261_vm0, %v448_v48 }
 0x389   : > { %739 = shalt.err (!%p736_p7)
}
 0x38a   : > { %s740_s29 = scalar_lea.hbm %s990_s9, 128  ;;  %s744_s22 = scalar_lea.hbm %s1038_s3, 256 }
 0x38b   : > { %p741_p9 = scmp.ne.s32.totalorder %s990_s9, %s740_s29  ;;  %p745_p0 = scmp.lt.u32.totalorder %s990_s9, %s1038_s3 }
 0x38c   : > { %p746_p11 = scmp.lt.u32.totalorder %s744_s22, %s740_s29  ;;  %p748_p4 = scmp.lt.u32.totalorder %s740_s29, %s990_s9 }
 0x38d   : > { %p742_p2 = pnand %p741_p9, %p917_p12 }
 0x38e   : > { %p747_p1 = por %p746_p11, %p745_p0 }
 0x38f   : > { %p743_p5 = pneg %p742_p2 }
 0x390   : > { %p749_p6 = por %p748_p4, %p747_p1 }
 0x392   : > { %p750_p8 = pnand %p749_p6, %p743_p5 }
 0x394   : > { %753 = shalt.err (!%p750_p8)
}
 0x395   : > { %600 = dma.vmem_to_hbm [thread:$0]  (%p917_p12), %s992_s26, 128, %s990_s9, %s451_s16  }
 0x396 PF: > { %s476_s18 = sand.u32 1, %s784_s12   ;;  %p1053_p10 = scmp.ne.s32.totalorder %s1043_s19, 0 }
 0x397   : > { %p1054_p13 = scmp.ge.s32.totalorder %s796_s15, 2  ;;  %s477_s20 = scalar_lea.sflag [#allocation4], %s476_s18 }
 0x399   : > { %p611_p3 = pnand %p1054_p13, %p1053_p10 }
 0x39b   : > { %779 = dma.done.wait (!%p611_p3), %s477_s20, 128  }
 0x39c   : > { %781 = vsyncadd (!%p611_p3), %s477_s20, 4294967168  ;;  %p17_p7 = scmp.ge.s32.totalorder %s882_s24, 4   ;;  %s1055_s12 = smov %s788_s13 }
 0x39d   : > { %s1056_s13 = smov %s792_s14  ;;  %s1057_s14 = smov %s913_s17 }
 0x39e   : > { %s1058_s15 = smov %s882_s24  ;;  %19 = sbr.rel (!%p17_p7) target bundleno = 6 (0x6), region = 81 }
 0x3a5   :  { %482 = vsyncpa [#allocation3], 1 }
 0x3a6   :  { %484 = vsyncpa [#allocation3 + $0x1], 1 }
 0x3a7   :  { %485 = vsyncpa [#allocation6], 1 }
 0x3a8   :  { %486 = vsyncpa [#allocation4], 1 }
 0x3a9   :  { %488 = vsyncpa [#allocation4 + $0x1], 1 }

</bundles_post_ra>
